<compile_context>
chip_gen: v5e
topology: v5e:2x2
jax: 0.10.0
libtpu: 0.0.40
codegen_flags: <defaults>
</compile_context>

<pallas_src>
import functools

import jax
import jax.numpy as jnp
from jax.experimental import pallas as pl
from jax.experimental.pallas import tpu as pltpu

_LANE = 128


def _round_up(x: int, m: int) -> int:
    return ((x + m - 1) // m) * m


def _largest_tile(total: int, cap: int) -> int:
    """Largest multiple of 128 that divides `total` (a multiple of 128) and is
    <= cap (always >= 128).  O(sqrt(total/128)) divisor enumeration."""
    m = total // _LANE
    cap_d = max(1, min(cap, total) // _LANE)
    best = 1
    i = 1
    while i * i <= m:
        if m % i == 0:
            for d in (i, m // i):
                if best < d <= cap_d:
                    best = d
        i += 1
    return best * _LANE


# ----------------------------- pass 1 kernel (fused) ------------------------
def _reduce_and_copy_kernel(x_ref, out_ref, part_ref, *, inv_nm1):
    """Per feature tile: copy x into the flat output and emit sum(per-lane std)."""
    x = x_ref[...]                       # (N, TILE_F) — read from HBM once
    out_ref[...] = x                     # fused lane-dense copy into the output

    xf = x.astype(jnp.float32)           # f32 accumulation regardless of input dtype
    mu = jnp.mean(xf, axis=0, keepdims=True)                 # (1, TILE_F)
    d = xf - mu
    var = jnp.sum(d * d, axis=0, keepdims=True) * inv_nm1    # unbiased (N-1)
    std = jnp.sqrt(var)                                       # EUP (free slot)
    tile_sum = jnp.sum(std)                                    # XLU cross-lane reduce
    # (1, 1, 128) broadcast of the scalar — 512 B per tile of partials.
    part_ref[...] = jnp.full(part_ref.shape, tile_sum, dtype=jnp.float32)


# ----------------------------- pass 1 kernel (reduce-only fallback) ---------
def _reduce_only_kernel(x_ref, part_ref, *, inv_nm1):
    xf = x_ref[...].astype(jnp.float32)
    mu = jnp.mean(xf, axis=0, keepdims=True)
    d = xf - mu
    std = jnp.sqrt(jnp.sum(d * d, axis=0, keepdims=True) * inv_nm1)
    part_ref[...] = jnp.full(part_ref.shape, jnp.sum(std), dtype=jnp.float32)


# ----------------------------- pass 2 kernel (slab fill) --------------------
def _fill_slab_kernel(mean_ref, buf_ref, out_ref):
    del buf_ref  # aliased with the output; present only to establish aliasing
    out_ref[...] = jnp.full(out_ref.shape, mean_ref[0, 0], dtype=out_ref.dtype)


@jax.jit
def mbstd(x):
    """Pallas implementation of MBSTD.forward for NCHW input."""
    n, c, h, w = x.shape
    s = h * w
    f = c * s
    dtype = x.dtype
    itemsize = dtype.itemsize
    # torch.std with N == 1 gives NaN (0/0); keep that behavior.
    inv_nm1 = (1.0 / (n - 1)) if n > 1 else float("nan")

    # Native sublane packing: f32 -> 8 rows, bf16 -> 16, int8 -> 32.  VMEM
    # blocks are padded to this, so the footprint math must use n_pad, not n.
    sublane = max(1, 32 // max(1, itemsize))
    n_pad = _round_up(n, sublane)

    # Lane-count caps (perf-review fixes; no fixed 4096 clamp):
    #  (a) ~8 MiB of (read + write) HBM traffic per grid step so the ~0.35 us
    #      per-step pipeline overhead is small even at v7x's 3.2 TB/s.
    cap_traffic = (8 << 20) // max(1, 2 * n * itemsize)
    #  (b) VMEM: 2x double-buffered in/out blocks + ~2 f32-sized temporaries,
    #      sized with the sublane-padded batch; keep under ~40 MiB so we stay
    #      well inside v7x's 64 MiB physical VMEM per TensorCore.
    cap_vmem = (40 << 20) // max(1, n_pad * (4 * itemsize + 8))
    cap = max(_LANE, min(cap_traffic, cap_vmem) // _LANE * _LANE)
    # Explicit scoped-VMEM limit: above v5e's 16 MiB / v6e-v7x's 32 MiB default,
    # below v7x's 64 MiB physical.
    vmem_limit = 48 << 20

    if s % _LANE == 0:
        # ---------------- fused fast path: x read once, written once --------
        w_total = (c + 1) * s
        x_flat = x.reshape(n, f)
        tile_f = _largest_tile(f, cap)
        n_tiles = f // tile_f
        # v7x megacore: prefer >= 2 grid steps when halving the tile still
        # moves >= ~2 MiB per step (otherwise per-step overhead dominates).
        if n_tiles < 2 and tile_f >= 2 * _LANE:
            min_lanes = max(_LANE, (2 << 20) // max(1, 2 * n * itemsize))
            t2 = _largest_tile(f, tile_f // 2)
            if t2 >= min_lanes and f // t2 >= 2:
                tile_f = t2
                n_tiles = f // tile_f
        # TODO(synk): if a v7x profile still shows exposed DMA, add
        # pipeline_mode=pl.Buffered(3) to the input BlockSpec (and account for
        # the extra block in the VMEM budget).

        flat_out, partials = pl.pallas_call(
            functools.partial(_reduce_and_copy_kernel, inv_nm1=inv_nm1),
            grid=(n_tiles,),
            in_specs=[pl.BlockSpec((n, tile_f), lambda i: (0, i))],
            out_specs=[
                pl.BlockSpec((n, tile_f), lambda i: (0, i)),
                pl.BlockSpec((1, 1, _LANE), lambda i: (i, 0, 0)),
            ],
            out_shape=[
                jax.ShapeDtypeStruct((n, w_total), dtype),
                jax.ShapeDtypeStruct((n_tiles, 1, _LANE), jnp.float32),
            ],
            compiler_params=pltpu.CompilerParams(
                dimension_semantics=("parallel",),
                vmem_limit_bytes=vmem_limit),
        )(x_flat)

        # Tiny cross-tile reduction (n_tiles * 512 B) finished in XLA.
        mean_std = jnp.sum(partials) / jnp.float32(_LANE * f)
        mean_smem = jnp.reshape(mean_std, (1, 1)).astype(jnp.float32)

        # ---------------- pass 2: fill the (N, H*W) scalar slab in place ----
        # Write-only slab; a single block whenever it fits a small VMEM budget.
        cap_s = max(_LANE,
                    ((16 << 20) // max(1, 2 * n_pad * itemsize)) // _LANE * _LANE)
        tile_s = _largest_tile(s, cap_s)
        n_s_tiles = s // tile_s
        col0 = f // tile_s  # exact: tile_s | s and f = c * s

        slab_spec = pl.BlockSpec((n, tile_s), lambda i: (0, col0 + i))
        flat_out = pl.pallas_call(
            _fill_slab_kernel,
            grid=(n_s_tiles,),
            in_specs=[
                pl.BlockSpec(memory_space=pltpu.MemorySpace.SMEM),  # mean scalar
                pl.BlockSpec(memory_space=pl.ANY),  # aliased buffer, no read DMA
            ],
            out_specs=slab_spec,
            out_shape=jax.ShapeDtypeStruct((n, w_total), dtype),
            input_output_aliases={1: 0},   # keep the x-portion written by pass 1
            compiler_params=pltpu.CompilerParams(
                dimension_semantics=("parallel",)),
        )(mean_smem, flat_out)

        return flat_out.reshape(n, c + 1, h, w)

    # ---------------- fallback: H*W not a multiple of 128 -------------------
    # Pallas does the std reduction on a zero-padded flat view (zero lanes have
    # std == 0, so the sum is unbiased); the concat is assembled by XLA.
    # TODO(synk): fuse the copy for ragged H*W as well (needs masked tail stores).
    x_flat = x.reshape(n, f)
    tile_f = max(_LANE, min(cap, _round_up(f, _LANE)))
    f_pad = _round_up(f, tile_f)
    if f_pad != f:
        x_flat = jnp.pad(x_flat, ((0, 0), (0, f_pad - f)))
    n_tiles = f_pad // tile_f
    partials = pl.pallas_call(
        functools.partial(_reduce_only_kernel, inv_nm1=inv_nm1),
        grid=(n_tiles,),
        in_specs=[pl.BlockSpec((n, tile_f), lambda i: (0, i))],
        out_specs=pl.BlockSpec((1, 1, _LANE), lambda i: (i, 0, 0)),
        out_shape=jax.ShapeDtypeStruct((n_tiles, 1, _LANE), jnp.float32),
        compiler_params=pltpu.CompilerParams(
            dimension_semantics=("parallel",),
            vmem_limit_bytes=vmem_limit),
    )(x_flat)
    mean_std = jnp.sum(partials) / jnp.float32(_LANE * f)
    slab = jnp.full((n, 1, h, w), mean_std, dtype=dtype)
    return jnp.concatenate([x, slab], axis=1)


if __name__ == "__main__":
    key = jax.random.PRNGKey(0)
    N, C, H, W = 2, 4, 16, 16
    x = jax.random.normal(key, (N, C, H, W), dtype=jnp.float32)

    out = jax.block_until_ready(mbstd(x))

    # Lightweight correctness check against a pure-jnp reference.
    std = jnp.std(x, axis=0, ddof=1)
    mean = jnp.mean(std)
    ref = jnp.concatenate(
        [x, jnp.full((N, 1, H, W), mean, dtype=x.dtype)], axis=1)
    assert out.shape == (N, C + 1, H, W), out.shape
    assert bool(jnp.allclose(out, ref, rtol=1e-4, atol=1e-4)), "mismatch vs reference"
    print("KERNEL_OK")
</pallas_src>

<mosaic_0001>
module attributes {stable_mosaic.version = 11 : i64} {
  func.func @_reduce_and_copy_kernel(%arg0: i32, %arg1: memref<2x1024xf32, #tpu.memory_space<vmem>>, %arg2: memref<2x1024xf32, #tpu.memory_space<vmem>>, %arg3: memref<1x1x128xf32, #tpu.memory_space<vmem>>) attributes {dimension_semantics = [#tpu.dimension_semantics<parallel>], iteration_bounds = array<i64: 1>, scalar_prefetch = 0 : i64, scratch_operands = 0 : i64, tpu.core_type = #tpu.core_type<tc>, window_params = [{transform_indices = @transform_0, window_bounds = array<i64: 2, 1024>}, {transform_indices = @transform_1, window_bounds = array<i64: 2, 1024>}, {transform_indices = @transform_2, window_bounds = array<i64: 1, 1, 128>}]} {
    %c0 = arith.constant 0 : index
    %c0_0 = arith.constant 0 : index
    %0 = vector.load %arg1[%c0, %c0_0] : memref<2x1024xf32, #tpu.memory_space<vmem>>, vector<2x1024xf32>
    %c0_1 = arith.constant 0 : index
    %c0_2 = arith.constant 0 : index
    %1 = vector.load %arg2[%c0_1, %c0_2] : memref<2x1024xf32, #tpu.memory_space<vmem>>, vector<2x1024xf32>
    tpu.vector_store %arg2[%c0_1, %c0_2], %0 {strides = array<i32>} : memref<2x1024xf32, #tpu.memory_space<vmem>>, vector<2x1024xf32>,
    %cst = arith.constant dense<0.000000e+00> : vector<1024xf32>
    %2 = vector.multi_reduction <add>, %0, %cst [0] : vector<2x1024xf32> to vector<1024xf32>
    %3 = vector.shape_cast %2 : vector<1024xf32> to vector<1x1024xf32>
    %cst_3 = arith.constant 2.000000e+00 : f32
    %4 = vector.broadcast %cst_3 : f32 to vector<1x1024xf32>
    %5 = arith.divf %3, %4 : vector<1x1024xf32>
    %6 = vector.broadcast %5 : vector<1x1024xf32> to vector<2x1024xf32>
    %7 = arith.subf %0, %6 : vector<2x1024xf32>
    %8 = arith.mulf %7, %7 : vector<2x1024xf32>
    %cst_4 = arith.constant dense<0.000000e+00> : vector<1024xf32>
    %9 = vector.multi_reduction <add>, %8, %cst_4 [0] : vector<2x1024xf32> to vector<1024xf32>
    %10 = vector.shape_cast %9 : vector<1024xf32> to vector<1x1024xf32>
    %cst_5 = arith.constant 1.000000e+00 : f32
    %11 = vector.broadcast %cst_5 : f32 to vector<1x1024xf32>
    %12 = arith.mulf %10, %11 : vector<1x1024xf32>
    %13 = math.sqrt %12 : vector<1x1024xf32>
    %14 = vector.shape_cast %13 : vector<1x1024xf32> to vector<1x1x1024xf32>
    %cst_6 = arith.constant dense<0.000000e+00> : vector<1xf32>
    %15 = vector.multi_reduction <add>, %14, %cst_6 [1, 2] : vector<1x1x1024xf32> to vector<1xf32>
    %16 = vector.shape_cast %15 : vector<1xf32> to vector<1x1x1xf32>
    %17 = vector.extract %16[0, 0, 0] : f32 from vector<1x1x1xf32>
    %18 = vector.broadcast %17 : f32 to vector<1x1x128xf32>
    %c0_7 = arith.constant 0 : index
    %c0_8 = arith.constant 0 : index
    %c0_9 = arith.constant 0 : index
    %19 = vector.load %arg3[%c0_7, %c0_8, %c0_9] : memref<1x1x128xf32, #tpu.memory_space<vmem>>, vector<1x1x128xf32>
    tpu.vector_store %arg3[%c0_7, %c0_8, %c0_9], %18 {strides = array<i32>} : memref<1x1x128xf32, #tpu.memory_space<vmem>>, vector<1x1x128xf32>,
    return
  }
  func.func @transform_0(%arg0: i32) -> (i32, i32) {
    %c0_i32 = arith.constant 0 : i32
    %c0_i32_0 = arith.constant 0 : i32
    return %c0_i32, %arg0 : i32, i32
  }
  func.func @transform_1(%arg0: i32) -> (i32, i32) {
    %c0_i32 = arith.constant 0 : i32
    %c0_i32_0 = arith.constant 0 : i32
    return %c0_i32, %arg0 : i32, i32
  }
  func.func @transform_2(%arg0: i32) -> (i32, i32, i32) {
    %c0_i32 = arith.constant 0 : i32
    %c0_i32_0 = arith.constant 0 : i32
    %c0_i32_1 = arith.constant 0 : i32
    return %arg0, %c0_i32, %c0_i32_0 : i32, i32, i32
  }
}

module attributes {stable_mosaic.version = 11 : i64} {
  func.func @_fill_slab_kernel(%arg0: i32, %arg1: memref<1x1xf32, #tpu.memory_space<smem>>, %arg2: memref<2x1280xf32, #tpu.memory_space<any>>, %arg3: memref<2x256xf32, #tpu.memory_space<vmem>>) attributes {dimension_semantics = [#tpu.dimension_semantics<parallel>], iteration_bounds = array<i64: 1>, scalar_prefetch = 0 : i64, scratch_operands = 0 : i64, tpu.core_type = #tpu.core_type<tc>, window_params = [{transform_indices = @transform_0, window_bounds = array<i64: 1, 1>}, {}, {transform_indices = @transform_2, window_bounds = array<i64: 2, 256>}]} {
    %c0 = arith.constant 0 : index
    %c0_0 = arith.constant 0 : index
    %0 = memref.load %arg1[%c0, %c0_0] : memref<1x1xf32, #tpu.memory_space<smem>>
    %1 = vector.broadcast %0 : f32 to vector<2x256xf32>
    %c0_1 = arith.constant 0 : index
    %c0_2 = arith.constant 0 : index
    %2 = vector.load %arg3[%c0_1, %c0_2] : memref<2x256xf32, #tpu.memory_space<vmem>>, vector<2x256xf32>
    tpu.vector_store %arg3[%c0_1, %c0_2], %1 {strides = array<i32>} : memref<2x256xf32, #tpu.memory_space<vmem>>, vector<2x256xf32>,
    return
  }
  func.func @transform_0(%arg0: i32) -> (i32, i32) {
    %c0_i32 = arith.constant 0 : i32
    %c0_i32_0 = arith.constant 0 : i32
    %c0_i32_1 = arith.constant 0 : i32
    return %c0_i32, %c0_i32_0 : i32, i32
  }
  func.func @transform_2(%arg0: i32) -> (i32, i32) {
    %c4_i32 = arith.constant 4 : i32
    %0 = arith.addi %c4_i32, %arg0 : i32
    %c0_i32 = arith.constant 0 : i32
    %c0_i32_0 = arith.constant 0 : i32
    return %c0_i32, %0 : i32, i32
  }
}

</mosaic_0001>

<bundles_post_ra>
// kernel: mbstd.3
= control target key start
LH: loop header
LB: loop body
LE: loop exit
PB: predicated region body
PF: predicated region fallthrough
CT: control target
= control target key end

     0   :  { %s75_s0 = inlined_call_operand.<no memory space> [shape: f32[1,1], index: 0, kind: input, shape index: {}]   ;;  %s76_s1 = inlined_call_operand.vmem [shape: f32[2,1280], index: 1, kind: input, shape index: {}, may-alias: {1,2}]   ;;  %s77_s2 = inlined_call_operand.vmem [shape: f32[2,1280], index: 2, kind: output, shape index: {}, may-alias: {1,2}]  }
   0x1   :  { %v25_v0 = vstv %s75_s0 }
   0x2   :  { %53 = vst [vmem:[%s77_s2 + $0x10] sm:$0xf] %v25_v0 }

// kernel: mbstd.2
= control target key start
LH: loop header
LB: loop body
LE: loop exit
PB: predicated region body
PF: predicated region fallthrough
CT: control target
= control target key end

     0   :  { %vm35_vm0 = vcmask 1041408   ;;  %v387_v10 = vmov 2.0   ;;  %vm122_vm2 = vcmask 1045508   ;;  %vm124_vm3 = vcmask 1043456   ;;  %s560_s0 = inlined_call_operand.vmem [shape: f32[2,1024], index: 0, kind: input, shape index: {}]   ;;  %s561_s1 = inlined_call_operand.vmem [shape: f32[2,1280], index: 1, kind: output, shape index: {0}]   ;;  %s562_s2 = inlined_call_operand.vmem [shape: f32[1,1,128], index: 2, kind: output, shape index: {1}]  }
   0x1   :  { %v406_v0 = vld [vmem:[%s560_s0] sm:$0xff]  ;;  %v411_v1 = vld [vmem:[%s560_s0 + $0x8] sm:$0xff]  ;;  %369 = vrcp.f32 %v387_v10  ;;  %vm308_vm14 = vcmask 1040384  }
   0x2   :  { %16 = vst [vmem:[#allocation1] ss:$4 sm:$0xff] %v406_v0 }
   0x3   :  { %18 = vst [vmem:[#allocation1 + $0x20] ss:$4 sm:$0xff] %v411_v1 }
   0x4   :  { %350 = vst [vmem:[%s561_s1] sm:$0xff] %v406_v0 }
   0x5   :  { %352 = vst [vmem:[%s561_s1 + $0x8] sm:$0xff] %v411_v1 }
   0x7   :  { %v370_v31 = vpop.eup %369 }
   0x8   :  { %v93_v53 = vmul.f32 2.0, %v370_v31  ;;  %vm97_vm1 = vweird.f32 %v370_v31 }
   0x9   :  { %v19_v2 = vld.sshfl [vmem:[#allocation1] sm:$0xff pattern:$0x73625140]  ;;  %v20_v3 = vld.sshfl [vmem:[#allocation1 + $0x8] sm:$0xff pattern:$0x73625140] }
   0xa   :  { %v21_v4 = vld.sshfl [vmem:[#allocation1 + $0x10] sm:$0xff pattern:$0x73625140]  ;;  %v22_v5 = vld.sshfl [vmem:[#allocation1 + $0x18] sm:$0xff pattern:$0x73625140] }
   0xb   :  { %v23_v6 = vld.sshfl [vmem:[#allocation1 + $0x20] sm:$0xff pattern:$0x73625140]  ;;  %v24_v7 = vld.sshfl [vmem:[#allocation1 + $0x28] sm:$0xff pattern:$0x73625140] }
   0xc   :  { %v25_v8 = vld.sshfl [vmem:[#allocation1 + $0x30] sm:$0xff pattern:$0x73625140]  ;;  %v26_v9 = vld.sshfl [vmem:[#allocation1 + $0x38] sm:$0xff pattern:$0x73625140] }
   0xd   :  { %v36_v11 = vsel %vm35_vm0, %v19_v2, 0.0  ;;  %v43_v12 = vsel %vm35_vm0, %v20_v3, 0.0  ;;  %v50_v13 = vsel %vm35_vm0, %v21_v4, 0.0  ;;  %v57_v14 = vsel %vm35_vm0, %v22_v5, 0.0 }
   0xe   :  { %v37_v15 = vrot.slane %v36_v11, 4  ;;  %v44_v16 = vrot.slane %v43_v12, 4  ;;  %v51_v17 = vrot.slane %v50_v13, 4  ;;  %v58_v18 = vrot.slane %v57_v14, 4 }
   0xf   :  { %v64_v19 = vsel %vm35_vm0, %v23_v6, 0.0  ;;  %v71_v20 = vsel %vm35_vm0, %v24_v7, 0.0  ;;  %v78_v21 = vsel %vm35_vm0, %v25_v8, 0.0  ;;  %v85_v22 = vsel %vm35_vm0, %v26_v9, 0.0 }
  0x10   :  { %v38_v23 = vadd.f32 %v37_v15, %v36_v11  ;;  %v45_v24 = vadd.f32 %v44_v16, %v43_v12  ;;  %v52_v25 = vadd.f32 %v51_v17, %v50_v13  ;;  %v59_v26 = vadd.f32 %v58_v18, %v57_v14 }
  0x11   :  { %v65_v27 = vrot.slane %v64_v19, 4  ;;  %v72_v28 = vrot.slane %v71_v20, 4  ;;  %v79_v29 = vrot.slane %v78_v21, 4  ;;  %v86_v30 = vrot.slane %v85_v22, 4 }
  0x12   :  { %v39_v32 = vrot.slane %v38_v23, 2  ;;  %v46_v33 = vrot.slane %v45_v24, 2  ;;  %v53_v34 = vrot.slane %v52_v25, 2  ;;  %v60_v35 = vrot.slane %v59_v26, 2 }
  0x13   :  { %v66_v36 = vadd.f32 %v65_v27, %v64_v19  ;;  %v73_v37 = vadd.f32 %v72_v28, %v71_v20  ;;  %v80_v38 = vadd.f32 %v79_v29, %v78_v21  ;;  %v87_v39 = vadd.f32 %v86_v30, %v85_v22 }
  0x14   :  { %v40_v44 = vadd.f32 %v39_v32, %v38_v23  ;;  %v47_v45 = vadd.f32 %v46_v33, %v45_v24  ;;  %v54_v46 = vadd.f32 %v53_v34, %v52_v25  ;;  %v61_v47 = vadd.f32 %v60_v35, %v59_v26 }
  0x15   :  { %v67_v40 = vrot.slane %v66_v36, 2  ;;  %v74_v41 = vrot.slane %v73_v37, 2  ;;  %v81_v42 = vrot.slane %v80_v38, 2  ;;  %v88_v43 = vrot.slane %v87_v39, 2 }
  0x16   :  { %v41_v52 = vrot.slane %v40_v44, 1  ;;  %v48_v54 = vrot.slane %v47_v45, 1  ;;  %v55_v55 = vrot.slane %v54_v46, 1  ;;  %v62_v56 = vrot.slane %v61_v47, 1 }
  0x17   :  { %v68_v48 = vadd.f32 %v67_v40, %v66_v36  ;;  %v75_v49 = vadd.f32 %v74_v41, %v73_v37  ;;  %v82_v50 = vadd.f32 %v81_v42, %v80_v38  ;;  %v89_v51 = vadd.f32 %v88_v43, %v87_v39 }
  0x18   :  { %v94_v61 = vsub.f32 1.0, %v93_v53  ;;  %v42_v62 = vadd.f32 %v41_v52, %v40_v44  ;;  %v49_v2 = vadd.f32 %v48_v54, %v47_v45  ;;  %v56_v3 = vadd.f32 %v55_v55, %v54_v46 }
  0x19   :  { %v69_v57 = vrot.slane %v68_v48, 1  ;;  %v76_v58 = vrot.slane %v75_v49, 1  ;;  %v83_v59 = vrot.slane %v82_v50, 1  ;;  %v90_v60 = vrot.slane %v89_v51, 1 }
  0x1a   :  { %v95_v63 = vmul.f32 %v370_v31, %v94_v61  ;;  %v63_v4 = vadd.f32 %v62_v56, %v61_v47 }
  0x1b   :  { %v70_v5 = vadd.f32 %v69_v57, %v68_v48  ;;  %v77_v6 = vadd.f32 %v76_v58, %v75_v49  ;;  %v84_v7 = vadd.f32 %v83_v59, %v82_v50  ;;  %v91_v8 = vadd.f32 %v90_v60, %v89_v51 }
  0x1c   :  { %v96_v9 = vadd.f32 %v370_v31, %v95_v63 }
  0x1e   :  { %v98_v10 = vsel %vm97_vm1, %v370_v31, %v96_v9 }
  0x1f   :  { %v99_v11 = vmul.f32 %v98_v10, %v42_v62  ;;  %v100_v12 = vmul.f32 %v98_v10, %v49_v2  ;;  %v101_v13 = vmul.f32 %v98_v10, %v56_v3  ;;  %v102_v14 = vmul.f32 %v98_v10, %v63_v4 }
  0x20   :  { %v103_v15 = vmul.f32 %v98_v10, %v70_v5  ;;  %v104_v16 = vmul.f32 %v98_v10, %v77_v6  ;;  %v105_v17 = vmul.f32 %v98_v10, %v84_v7  ;;  %v106_v18 = vmul.f32 %v98_v10, %v91_v8 }
  0x21   :  { %v115_v19 = vrot.slane %v100_v12, 6  ;;  %v116_v20 = vrot.slane %v101_v13, 4  ;;  %v117_v21 = vrot.slane %v102_v14, 2 }
  0x22   :  { %v118_v22 = vrot.slane %v104_v16, 6  ;;  %v119_v23 = vrot.slane %v105_v17, 4  ;;  %v120_v24 = vrot.slane %v106_v18, 2 }
  0x23   :  { %v121_v25 = vsel %vm35_vm0, %v99_v11, %v115_v19  ;;  %v123_v26 = vsel %vm122_vm2, %v116_v20, %v117_v21 }
  0x24   :  { %v125_v27 = vsel %vm124_vm3, %v121_v25, %v123_v26  ;;  %v126_v28 = vsel %vm35_vm0, %v103_v15, %v118_v22  ;;  %v127_v29 = vsel %vm122_vm2, %v119_v23, %v120_v24 }
  0x25   :  { %v128_v30 = vsel %vm124_vm3, %v126_v28, %v127_v29  ;;  %v131_v31 = vsub.f32 %v406_v0, %v125_v27 }
  0x26   :  { %v132_v32 = vsub.f32 %v411_v1, %v128_v30 }
  0x27   :  { %v133_v33 = vmul.f32 %v131_v31, %v131_v31 }
  0x28   :  { %v134_v34 = vmul.f32 %v132_v32, %v132_v32 }
  0x29   :  { %137 = vst [vmem:[#allocation1] ss:$4 sm:$0xff] %v133_v33 }
  0x2a   :  { %139 = vst [vmem:[#allocation1 + $0x20] ss:$4 sm:$0xff] %v134_v34 }
  0x30   :  { %v140_v35 = vld.sshfl [vmem:[#allocation1] sm:$0xff pattern:$0x73625140]  ;;  %v141_v36 = vld.sshfl [vmem:[#allocation1 + $0x8] sm:$0xff pattern:$0x73625140] }
  0x31   :  { %v142_v37 = vld.sshfl [vmem:[#allocation1 + $0x10] sm:$0xff pattern:$0x73625140]  ;;  %v143_v38 = vld.sshfl [vmem:[#allocation1 + $0x18] sm:$0xff pattern:$0x73625140] }
  0x32   :  { %v144_v39 = vld.sshfl [vmem:[#allocation1 + $0x20] sm:$0xff pattern:$0x73625140]  ;;  %v145_v40 = vld.sshfl [vmem:[#allocation1 + $0x28] sm:$0xff pattern:$0x73625140] }
  0x33   :  { %v146_v41 = vld.sshfl [vmem:[#allocation1 + $0x30] sm:$0xff pattern:$0x73625140]  ;;  %v147_v42 = vld.sshfl [vmem:[#allocation1 + $0x38] sm:$0xff pattern:$0x73625140] }
  0x34   :  { %v156_v43 = vsel %vm35_vm0, %v140_v35, 0.0  ;;  %v163_v44 = vsel %vm35_vm0, %v141_v36, 0.0  ;;  %v170_v0 = vsel %vm35_vm0, %v142_v37, 0.0  ;;  %v177_v1 = vsel %vm35_vm0, %v143_v38, 0.0 }
  0x35   :  { %v157_v45 = vrot.slane %v156_v43, 4  ;;  %v164_v46 = vrot.slane %v163_v44, 4  ;;  %v171_v47 = vrot.slane %v170_v0, 4  ;;  %v178_v48 = vrot.slane %v177_v1, 4 }
  0x36   :  { %v184_v49 = vsel %vm35_vm0, %v144_v39, 0.0  ;;  %v191_v50 = vsel %vm35_vm0, %v145_v40, 0.0  ;;  %v198_v51 = vsel %vm35_vm0, %v146_v41, 0.0  ;;  %v205_v52 = vsel %vm35_vm0, %v147_v42, 0.0 }
  0x37   :  { %v158_v53 = vadd.f32 %v157_v45, %v156_v43  ;;  %v165_v54 = vadd.f32 %v164_v46, %v163_v44  ;;  %v172_v55 = vadd.f32 %v171_v47, %v170_v0  ;;  %v179_v56 = vadd.f32 %v178_v48, %v177_v1 }
  0x38   :  { %v185_v57 = vrot.slane %v184_v49, 4  ;;  %v192_v58 = vrot.slane %v191_v50, 4  ;;  %v199_v59 = vrot.slane %v198_v51, 4  ;;  %v206_v60 = vrot.slane %v205_v52, 4 }
  0x39   :  { %v159_v61 = vrot.slane %v158_v53, 2  ;;  %v166_v62 = vrot.slane %v165_v54, 2  ;;  %v173_v63 = vrot.slane %v172_v55, 2  ;;  %v180_v2 = vrot.slane %v179_v56, 2 }
  0x3a   :  { %v186_v3 = vadd.f32 %v185_v57, %v184_v49  ;;  %v193_v4 = vadd.f32 %v192_v58, %v191_v50  ;;  %v200_v5 = vadd.f32 %v199_v59, %v198_v51  ;;  %v207_v6 = vadd.f32 %v206_v60, %v205_v52 }
  0x3b   :  { %v160_v7 = vadd.f32 %v159_v61, %v158_v53  ;;  %v167_v8 = vadd.f32 %v166_v62, %v165_v54  ;;  %v174_v9 = vadd.f32 %v173_v63, %v172_v55  ;;  %v181_v10 = vadd.f32 %v180_v2, %v179_v56 }
  0x3c   :  { %v187_v11 = vrot.slane %v186_v3, 2  ;;  %v194_v12 = vrot.slane %v193_v4, 2  ;;  %v201_v13 = vrot.slane %v200_v5, 2  ;;  %v208_v14 = vrot.slane %v207_v6, 2 }
  0x3d   :  { %v161_v15 = vrot.slane %v160_v7, 1  ;;  %v168_v16 = vrot.slane %v167_v8, 1  ;;  %v175_v17 = vrot.slane %v174_v9, 1  ;;  %v182_v18 = vrot.slane %v181_v10, 1 }
  0x3e   :  { %v188_v19 = vadd.f32 %v187_v11, %v186_v3  ;;  %v195_v20 = vadd.f32 %v194_v12, %v193_v4  ;;  %v202_v21 = vadd.f32 %v201_v13, %v200_v5  ;;  %v209_v22 = vadd.f32 %v208_v14, %v207_v6 }
  0x3f   :  { %v445_v23 = vadd.f32 %v161_v15, %v160_v7  ;;  %v447_v24 = vadd.f32 %v168_v16, %v167_v8  ;;  %v449_v25 = vadd.f32 %v175_v17, %v174_v9  ;;  %v451_v29 = vadd.f32 %v182_v18, %v181_v10 }
  0x40   :  { %v189_v26 = vrot.slane %v188_v19, 1  ;;  %v196_v27 = vrot.slane %v195_v20, 1  ;;  %v203_v28 = vrot.slane %v202_v21, 1  ;;  %v210_v30 = vrot.slane %v209_v22, 1 }
  0x41   :  { %371 = vrsqrt.f32 %v445_v23  ;;  %vm219_vm4 = vcmp.eq.f32.partialorder %v445_v23, inf  ;;  %vm221_vm5 = vcmp.eq.f32.partialorder %v445_v23, 0.0  ;;  %v222_v40 = vand.u32 2147483648, %v445_v23 }
  0x42   :  { %v454_v31 = vadd.f32 %v189_v26, %v188_v19  ;;  %v456_v32 = vadd.f32 %v196_v27, %v195_v20  ;;  %373 = vrsqrt.f32 %v447_v24  ;;  %v459_v33 = vadd.f32 %v203_v28, %v202_v21 }
  0x43   :  { %375 = vrsqrt.f32 %v449_v25  ;;  %v462_v34 = vadd.f32 %v210_v30, %v209_v22  ;;  %vm231_vm6 = vcmp.eq.f32.partialorder %v447_v24, inf  ;;  %v234_v43 = vand.u32 2147483648, %v447_v24 }
  0x44   :  { %377 = vrsqrt.f32 %v451_v29  ;;  %v246_v0 = vand.u32 2147483648, %v449_v25  ;;  %vm233_vm7 = vcmp.eq.f32.partialorder %v447_v24, 0.0  ;;  %vm243_vm8 = vcmp.eq.f32.partialorder %v449_v25, inf }
  0x45   :  { %379 = vrsqrt.f32 %v454_v31  ;;  %v258_v48 = vand.u32 2147483648, %v451_v29  ;;  %vm245_vm9 = vcmp.eq.f32.partialorder %v449_v25, 0.0  ;;  %vm255_vm10 = vcmp.eq.f32.partialorder %v451_v29, inf }
  0x46   :  { %381 = vrsqrt.f32 %v456_v32  ;;  %v270_v52 = vand.u32 2147483648, %v454_v31  ;;  %v282_v53 = vand.u32 2147483648, %v456_v32  ;;  %vm257_vm11 = vcmp.eq.f32.partialorder %v451_v29, 0.0 }
  0x47   :  { %v372_v35 = vpop.eup %371  ;;  %383 = vrsqrt.f32 %v459_v33  ;;  %vm267_vm12 = vcmp.eq.f32.partialorder %v454_v31, inf  ;;  %vm279_vm13 = vcmp.eq.f32.partialorder %v456_v32, inf  ;;  %vm269_vm15 = vcmp.eq.f32.partialorder %v454_v31, 0.0 }
  0x48   :  { %v213_v36 = vmul.f32 %v372_v35, %v445_v23  ;;  %v374_v37 = vpop.eup %373  ;;  %385 = vrsqrt.f32 %v462_v34  ;;  %vm291_vm0 = vcmp.eq.f32.partialorder %v459_v33, inf  ;;  %vm281_vm1 = vcmp.eq.f32.partialorder %v456_v32, 0.0 }
  0x49   :  { %v376_v38 = vpop.eup %375  ;;  %v225_v41 = vmul.f32 %v374_v37, %v447_v24  ;;  %vm303_vm2 = vcmp.eq.f32.partialorder %v462_v34, inf  ;;  %vm293_vm3 = vcmp.eq.f32.partialorder %v459_v33, 0.0 }
  0x4a   :  { %v214_v39 = vmul.f32 %v372_v35, %v213_v36  ;;  %v378_v42 = vpop.eup %377  ;;  %v237_v44 = vmul.f32 %v376_v38, %v449_v25 }
  0x4b   :  { %v380_v1 = vpop.eup %379  ;;  %v226_v46 = vmul.f32 %v374_v37, %v225_v41  ;;  %v249_v47 = vmul.f32 %v378_v42, %v451_v29 }
  0x4c   :  { %v215_v45 = vmul.f32 0.5, %v214_v39  ;;  %v382_v49 = vpop.eup %381  ;;  %v238_v50 = vmul.f32 %v376_v38, %v237_v44  ;;  %v261_v51 = vmul.f32 %v380_v1, %v454_v31 }
  0x4d   :  { %v384_v54 = vpop.eup %383  ;;  %v227_v56 = vmul.f32 0.5, %v226_v46  ;;  %v250_v57 = vmul.f32 %v378_v42, %v249_v47  ;;  %v273_v58 = vmul.f32 %v382_v49, %v456_v32 }
  0x4e   :  { %v216_v55 = vsub.f32 1.5, %v215_v45  ;;  %v386_v59 = vpop.eup %385  ;;  %v239_v60 = vmul.f32 0.5, %v238_v50  ;;  %v262_v61 = vmul.f32 %v380_v1, %v261_v51  ;;  %v285_v62 = vmul.f32 %v384_v54, %v459_v33 }
  0x4f   :  { %v228_v2 = vsub.f32 1.5, %v227_v56  ;;  %v251_v3 = vmul.f32 0.5, %v250_v57  ;;  %v274_v4 = vmul.f32 %v382_v49, %v273_v58  ;;  %v297_v8 = vmul.f32 %v386_v59, %v462_v34 }
  0x50   :  { %v217_v63 = vmul.f32 %v372_v35, %v216_v55  ;;  %v240_v5 = vsub.f32 1.5, %v239_v60  ;;  %v263_v6 = vmul.f32 0.5, %v262_v61  ;;  %v286_v7 = vmul.f32 %v384_v54, %v285_v62 }
  0x51   :  { %v229_v10 = vmul.f32 %v374_v37, %v228_v2  ;;  %v252_v11 = vsub.f32 1.5, %v251_v3  ;;  %v275_v12 = vmul.f32 0.5, %v274_v4  ;;  %v298_v16 = vmul.f32 %v386_v59, %v297_v8 }
  0x52   :  { %v218_v9 = vmul.f32 %v217_v63, %v445_v23  ;;  %v241_v13 = vmul.f32 %v376_v38, %v240_v5  ;;  %v264_v14 = vsub.f32 1.5, %v263_v6  ;;  %v287_v15 = vmul.f32 0.5, %v286_v7 }
  0x53   :  { %v230_v18 = vmul.f32 %v229_v10, %v447_v24  ;;  %v253_v19 = vmul.f32 %v378_v42, %v252_v11  ;;  %v276_v20 = vsub.f32 1.5, %v275_v12  ;;  %v299_v36 = vmul.f32 0.5, %v298_v16 }
  0x54   :  { %v220_v17 = vsel %vm219_vm4, %v445_v23, %v218_v9  ;;  %v242_v22 = vmul.f32 %v241_v13, %v449_v25  ;;  %v265_v26 = vmul.f32 %v380_v1, %v264_v14  ;;  %v288_v27 = vsub.f32 1.5, %v287_v15 }
  0x55   :  { %v223_v21 = vsel %vm221_vm5, %v222_v40, %v220_v17  ;;  %v232_v28 = vsel %vm231_vm6, %v447_v24, %v230_v18  ;;  %v254_v30 = vmul.f32 %v253_v19, %v451_v29  ;;  %v277_v35 = vmul.f32 %v382_v49, %v276_v20 }
  0x56   :  { %v235_v37 = vsel %vm233_vm7, %v234_v43, %v232_v28  ;;  %v244_v23 = vsel %vm243_vm8, %v449_v25, %v242_v22  ;;  %v266_v38 = vmul.f32 %v265_v26, %v454_v31  ;;  %v289_v39 = vmul.f32 %v384_v54, %v288_v27 }
  0x57   :  { %v247_v40 = vsel %vm245_vm9, %v246_v0, %v244_v23  ;;  %v256_v41 = vsel %vm255_vm10, %v451_v29, %v254_v30  ;;  %v278_v42 = vmul.f32 %v277_v35, %v456_v32  ;;  %v300_v24 = vsub.f32 1.5, %v299_v36 }
  0x58   :  { %v259_v43 = vsel %vm257_vm11, %v258_v48, %v256_v41  ;;  %v268_v44 = vsel %vm267_vm12, %v454_v31, %v266_v38  ;;  %v290_v1 = vmul.f32 %v289_v39, %v459_v33  ;;  %v309_v45 = vsel %vm308_vm14, %v223_v21, 0.0 }
  0x59   :  { %v280_v25 = vsel %vm279_vm13, %v456_v32, %v278_v42  ;;  %v294_v0 = vand.u32 2147483648, %v459_v33  ;;  %v301_v46 = vmul.f32 %v386_v59, %v300_v24  ;;  %v310_v47 = vsel %vm308_vm14, %v235_v37, 0.0 }
  0x5a   :  { %v271_v29 = vsel %vm269_vm15, %v270_v52, %v268_v44  ;;  %v311_v48 = vadd.f32 %v310_v47, %v309_v45  ;;  %v312_v49 = vsel %vm308_vm14, %v247_v40, 0.0  ;;  %v292_v50 = vsel %vm291_vm0, %v459_v33, %v290_v1 }
  0x5b   :  { %v302_v51 = vmul.f32 %v301_v46, %v462_v34  ;;  %v314_v54 = vsel %vm308_vm14, %v259_v43, 0.0  ;;  %v283_v31 = vsel %vm281_vm1, %v282_v53, %v280_v25  ;;  %v306_v52 = vand.u32 2147483648, %v462_v34 }
  0x5c   :  { %v313_v55 = vadd.f32 %v312_v49, %v311_v48  ;;  %vm305_vm4 = vcmp.eq.f32.partialorder %v462_v34, 0.0  ;;  %v316_v57 = vsel %vm308_vm14, %v271_v29, 0.0  ;;  %v295_v58 = vsel %vm293_vm3, %v294_v0, %v292_v50 }
  0x5d   :  { %v304_v56 = vsel %vm303_vm2, %v462_v34, %v302_v51  ;;  %v318_v59 = vsel %vm308_vm14, %v283_v31, 0.0  ;;  %v320_v62 = vsel %vm308_vm14, %v295_v58, 0.0 }
  0x5e   :  { %v315_v33 = vadd.f32 %v314_v54, %v313_v55  ;;  %v307_v60 = vsel %vm305_vm4, %v306_v52, %v304_v56 }
  0x5f   :  { %v322_v32 = vsel %vm308_vm14, %v307_v60, 0.0 }
  0x60   :  { %v317_v61 = vadd.f32 %v316_v57, %v315_v33 }
  0x62   :  { %v319_v63 = vadd.f32 %v318_v59, %v317_v61 }
  0x64   :  { %v321_v53 = vadd.f32 %v320_v62, %v319_v63 }
  0x66   :  { %v323_v2 = vadd.f32 %v322_v32, %v321_v53 }
  0x68   :  { %324 = vadd.xlane.f32.xlu0 %v323_v2 }
  0xdb   :  { %v325_v3 = vpop.xlane.xlu0 %324 }
  0xdc   :  { %v326_v4 = vrot.slane %v325_v3, 4 }
  0xde   :  { %v327_v5 = vadd.f32 %v326_v4, %v325_v3 }
  0xe0   :  { %v328_v34 = vrot.slane %v327_v5, 2 }
  0xe2   :  { %v329_v6 = vadd.f32 %v328_v34, %v327_v5 }
  0xe4   :  { %v330_v7 = vrot.slane %v329_v6, 1 }
  0xe6   :  { %v331_v8 = vadd.f32 %v330_v7, %v329_v6 }
  0xe8   :  { %366 = vpush %v331_v8 }
 0x119   :  { %s367_s0 = spop %366 }
 0x11a   :  { %v333_v9 = vstv %s367_s0 }
 0x11b   :  { %334 = vst [vmem:[%s562_s2] sm:$0x1] %v333_v9 }

</bundles_post_ra>
